<compile_context>
chip_gen: v5e
topology: v5e:2x2
jax: 0.10.0
libtpu: 0.0.40
codegen_flags: <defaults>
</compile_context>

<pallas_src>
import math
import functools

import jax
import jax.numpy as jnp
from jax import lax
from jax.experimental import pallas as pl
from jax.experimental.pallas import tpu as pltpu


def _round_up(a, b):
    return (a + b - 1) // b * b


def _vmem_limit_bytes():
    """Per-generation VMEM limit with headroom (v5e/v6e ~96 MiB, v7x ~48 MiB)."""
    cap = 64 * 1024 * 1024
    try:
        cap = int(pltpu.get_tpu_info().vmem_capacity_bytes)
    except Exception:
        pass
    return max(32 * 1024 * 1024, min((cap * 3) // 4, 100 * 1024 * 1024))


def _largest_divisor_tile(dim, align, cap):
    """Largest multiple of `align` that divides `dim` and is <= cap (or None)."""
    if dim % align != 0:
        return None
    best = None
    t = align
    top = min(cap, dim)
    while t <= top:
        if dim % t == 0:
            best = t
        t += align
    return best


# --------------------------------------------------------------------------- #
# Kernels
# --------------------------------------------------------------------------- #
def _cosine_tile(x_ref, w_ref):
    """(TM, TN) cosine similarities of raw x rows vs raw W rows.

    Row-norm reciprocals are computed in f32 from the tiles already resident
    in VMEM (no extra wrapper pass over the (C, F) weight in HBM).  W rows are
    pre-scaled (keeps the (rows, F) layout, no relayout); x's reciprocal is a
    (TM, 1) post-scale on the f32 MXU accumulator.  Zero pad rows stay exactly
    zero (0 * rsqrt(1e-24) == 0).
    """
    w32 = w_ref[...].astype(jnp.float32)
    inv_wn = lax.rsqrt(jnp.maximum(jnp.sum(w32 * w32, axis=1, keepdims=True), 1e-24))
    wn = (w32 * inv_wn).astype(w_ref.dtype)                       # (TN, F)

    x32 = x_ref[...].astype(jnp.float32)
    inv_xn = lax.rsqrt(jnp.maximum(jnp.sum(x32 * x32, axis=1, keepdims=True), 1e-24))

    raw = lax.dot_general(
        x_ref[...], wn,
        dimension_numbers=(((1,), (1,)), ((), ())),
        preferred_element_type=jnp.float32,
    )                                                             # (TM, TN) f32
    return raw * inv_xn


def _logits_kernel(x_ref, w_ref, out_ref):
    out_ref[...] = _cosine_tile(x_ref, w_ref).astype(out_ref.dtype)


def _arcface_kernel(x_ref, w_ref, label_ref, out_ref, *, s, cos_m, sin_m, tn):
    logits = _cosine_tile(x_ref, w_ref)                           # (TM, TN) f32

    # Boolean "one-hot": global class ids of this class tile vs per-row labels.
    lbl = label_ref[...]                                          # (TM, 1) i32
    class_ids = pl.program_id(0) * tn + lax.broadcasted_iota(
        jnp.int32, logits.shape, 1)
    mask = class_ids == lbl                                       # (TM, TN)

    # Per-row margin: pull the label-column cosine out to a (TM,1) vector
    # (rows whose label is outside this class tile contribute 0, never used),
    # apply cos(acos(c)+m) = c*cos(m) - sqrt(1-c^2)*sin(m) on (TM,1) only,
    # and merge back with a single where (no float one-hot, no scatter).
    c = jnp.sum(jnp.where(mask, logits, 0.0), axis=1, keepdims=True)
    c = jnp.clip(c, -1.0 + 1e-07, 1.0 - 1e-07)
    target = c * cos_m - jnp.sqrt(1.0 - c * c) * sin_m            # (TM, 1)

    out_ref[...] = jnp.where(mask, s * target, s * logits).astype(out_ref.dtype)


# --------------------------------------------------------------------------- #
# Wrapper
# --------------------------------------------------------------------------- #
def arcface_product(x, W, label=None, s=30.0, m=0.5, *,
                    compute_dtype=jnp.bfloat16, out_dtype=jnp.float32,
                    block_b=None, block_c=None):
    """Pallas implementation of ArcFaceProduct.forward.

    x: (B, F), W: (C, F), label: optional (B,) int -> (B, C) logits.
    compute_dtype: MXU operand dtype (bf16 by default, f32 accumulation).
    out_dtype: output dtype (bf16 halves the dominant HBM write stream).
    block_b / block_c: optional hard caps on the batch / class tile.
    """
    B, F = x.shape
    C, F2 = W.shape
    assert F == F2

    cb = jnp.dtype(compute_dtype).itemsize
    ob = jnp.dtype(out_dtype).itemsize
    row_align = 16 if min(cb, ob) < 4 else 8
    vmem_limit = _vmem_limit_bytes()

    # --- class tile: lane-dense (multiple of 128), large, and a divisor of C
    # when possible so no class padding / de-pad slice is needed.
    tn_cap = 2048 if block_c is None else max(128, block_c)
    tn = _largest_divisor_tile(C, 128, tn_cap)
    if tn is None:
        tn = min(_round_up(C, 128), _round_up(tn_cap, 128))

    # --- batch tile: whole (padded) batch when it fits the VMEM budget so W
    # is streamed from HBM exactly once; otherwise a capped tile.
    tm_full = _round_up(B, row_align)

    def _fits(tm_, tn_):
        need = 2 * (tm_ * F * cb + tn_ * F * cb + tm_ * tn_ * ob) + 8 * tm_
        return need <= int(0.6 * vmem_limit)

    if block_b is None:
        tm = tm_full if _fits(tm_full, tn) else _round_up(512, row_align)
    else:
        tm = min(tm_full, _round_up(block_b, row_align))
    while not _fits(tm, tn) and tn > 128:
        tn = _round_up(tn // 2, 128)
    while not _fits(tm, tn) and tm > row_align:
        tm = _round_up(tm // 2, row_align)

    Bp = _round_up(B, tm)
    Cp = _round_up(C, tn)

    # Pad only the axes that actually need it.
    x_c = x.astype(compute_dtype)
    w_c = W.astype(compute_dtype)
    if Bp != B:
        x_c = jnp.pad(x_c, ((0, Bp - B), (0, 0)))
    if Cp != C:
        w_c = jnp.pad(w_c, ((0, Cp - C), (0, 0)))

    # Class axis OUTER: W block held in VMEM across the inner batch axis
    # (Pallas skips the DMA when the block index is unchanged) and v7x
    # megacore shards class tiles across both TensorCores.
    grid = (Cp // tn, Bp // tm)
    x_spec = pl.BlockSpec((tm, F), lambda j, i: (i, 0))
    w_spec = pl.BlockSpec((tn, F), lambda j, i: (j, 0))
    out_spec = pl.BlockSpec((tm, tn), lambda j, i: (i, j))
    out_shape = jax.ShapeDtypeStruct((Bp, Cp), out_dtype)
    cparams = pltpu.CompilerParams(
        dimension_semantics=("parallel", "parallel"),
        vmem_limit_bytes=vmem_limit,
    )

    if label is None:
        out = pl.pallas_call(
            _logits_kernel,
            out_shape=out_shape,
            grid=grid,
            in_specs=[x_spec, w_spec],
            out_specs=out_spec,
            compiler_params=cparams,
        )(x_c, w_c)
    else:
        label_c = label.reshape(B, 1).astype(jnp.int32)
        if Bp != B:
            # Padded rows get label -1 so the margin path never triggers on them.
            label_c = jnp.pad(label_c, ((0, Bp - B), (0, 0)), constant_values=-1)
        lbl_spec = pl.BlockSpec((tm, 1), lambda j, i: (i, 0))
        kernel = functools.partial(
            _arcface_kernel, s=float(s), cos_m=math.cos(m), sin_m=math.sin(m), tn=tn)
        out = pl.pallas_call(
            kernel,
            out_shape=out_shape,
            grid=grid,
            in_specs=[x_spec, w_spec, lbl_spec],
            out_specs=out_spec,
            compiler_params=cparams,
        )(x_c, w_c, label_c)

    if Bp == B and Cp == C:
        return out                    # no padding -> no extra copy
    return out[:B, :C]


# --------------------------------------------------------------------------- #
# Reference (pure JAX, mirrors the PyTorch module) and self-test
# --------------------------------------------------------------------------- #
def _reference(x, W, label=None, s=30.0, m=0.5):
    xn = x / jnp.maximum(jnp.linalg.norm(x, axis=1, keepdims=True), 1e-12)
    wn = W / jnp.maximum(jnp.linalg.norm(W, axis=1, keepdims=True), 1e-12)
    logits = xn @ wn.T
    if label is None:
        return logits
    theta = jnp.arccos(jnp.clip(logits, -1.0 + 1e-07, 1.0 - 1e-07))
    target = jnp.cos(theta + m)
    one_hot = jax.nn.one_hot(label, W.shape[0], dtype=logits.dtype)
    return (logits * (1 - one_hot) + target * one_hot) * s


if __name__ == "__main__":
    key = jax.random.PRNGKey(0)
    s, m = 30.0, 0.5

    # ---- Test 1: small module-consistent shapes ----------------------------
    B, num_features, num_classes = 8, 32, 16
    kx, kw, kl, k2x, k2w, k2l = jax.random.split(key, 6)
    x = jax.random.normal(kx, (B, num_features), dtype=jnp.float32)
    bound = math.sqrt(6.0 / (num_features + num_classes))  # xavier_uniform_
    W = jax.random.uniform(kw, (num_classes, num_features), dtype=jnp.float32,
                           minval=-bound, maxval=bound)
    label = jax.random.randint(kl, (B,), 0, num_classes, dtype=jnp.int32)

    ref = _reference(x, W, label, s=s, m=m)
    ref_logits = _reference(x, W, None)

    # Exact-math path (f32 MXU operands) — tight tolerance.
    out_f32 = jax.block_until_ready(
        arcface_product(x, W, label, s=s, m=m, compute_dtype=jnp.float32))
    assert jnp.allclose(out_f32, ref, atol=1e-3, rtol=1e-3), "f32 with-label mismatch"
    logits_f32 = jax.block_until_ready(
        arcface_product(x, W, None, compute_dtype=jnp.float32))
    assert jnp.allclose(logits_f32, ref_logits, atol=1e-3, rtol=1e-3), "f32 logits mismatch"

    # Fast path (bf16 MXU operands + bf16 output) — looser tolerance.
    out_bf16 = jax.block_until_ready(
        arcface_product(x, W, label, s=s, m=m, out_dtype=jnp.bfloat16))
    assert jnp.allclose(out_bf16.astype(jnp.float32), ref,
                        atol=6e-1, rtol=6e-2), "bf16 with-label mismatch"

    # ---- Test 2: multi-tile grid (class-tile iota offset, batch tiling, pad) -
    B2, F2, C2 = 16, 32, 300          # -> grid (3, 2) with block_b=8, block_c=128
    x2 = jax.random.normal(k2x, (B2, F2), dtype=jnp.float32)
    W2 = jax.random.normal(k2w, (C2, F2), dtype=jnp.float32) * 0.1
    label2 = jax.random.randint(k2l, (B2,), 0, C2, dtype=jnp.int32)
    ref2 = _reference(x2, W2, label2, s=s, m=m)
    out2 = jax.block_until_ready(
        arcface_product(x2, W2, label2, s=s, m=m,
                        compute_dtype=jnp.float32, block_b=8, block_c=128))
    assert jnp.allclose(out2, ref2, atol=1e-3, rtol=1e-3), "tiled with-label mismatch"
    ref2_logits = _reference(x2, W2, None)
    out2_logits = jax.block_until_ready(
        arcface_product(x2, W2, None, compute_dtype=jnp.float32,
                        block_b=8, block_c=128))
    assert jnp.allclose(out2_logits, ref2_logits,
                        atol=1e-3, rtol=1e-3), "tiled logits mismatch"

    print("KERNEL_OK")
</pallas_src>

<mosaic_0001>
module attributes {stable_mosaic.version = 11 : i64} {
  func.func @_arcface_kernel(%arg0: i32, %arg1: i32, %arg2: memref<8x32xf32, #tpu.memory_space<vmem>>, %arg3: memref<128x32xf32, #tpu.memory_space<vmem>>, %arg4: memref<8x1xi32, #tpu.memory_space<vmem>>, %arg5: memref<8x128xf32, #tpu.memory_space<vmem>>) attributes {dimension_semantics = [#tpu.dimension_semantics<parallel>, #tpu.dimension_semantics<parallel>], iteration_bounds = array<i64: 1, 1>, scalar_prefetch = 0 : i64, scratch_operands = 0 : i64, tpu.core_type = #tpu.core_type<tc>, window_params = [{transform_indices = @transform_0, window_bounds = array<i64: 8, 32>}, {transform_indices = @transform_1, window_bounds = array<i64: 128, 32>}, {transform_indices = @transform_2, window_bounds = array<i64: 8, 1>}, {transform_indices = @transform_3, window_bounds = array<i64: 8, 128>}]} {
    %c0 = arith.constant 0 : index
    %c0_0 = arith.constant 0 : index
    %0 = vector.load %arg3[%c0, %c0_0] : memref<128x32xf32, #tpu.memory_space<vmem>>, vector<128x32xf32>
    %1 = arith.mulf %0, %0 : vector<128x32xf32>
    %cst = arith.constant dense<0.000000e+00> : vector<128xf32>
    %2 = vector.multi_reduction <add>, %1, %cst [1] : vector<128x32xf32> to vector<128xf32>
    %3 = vector.shape_cast %2 : vector<128xf32> to vector<128x1xf32>
    %cst_1 = arith.constant 1.000000e-24 : f32
    %4 = vector.broadcast %cst_1 : f32 to vector<128x1xf32>
    %5 = arith.maximumf %3, %4 : vector<128x1xf32>
    %6 = math.rsqrt %5 : vector<128x1xf32>
    %7 = vector.broadcast %6 : vector<128x1xf32> to vector<128x32xf32>
    %8 = arith.mulf %0, %7 : vector<128x32xf32>
    %c0_2 = arith.constant 0 : index
    %c0_3 = arith.constant 0 : index
    %9 = vector.load %arg2[%c0_2, %c0_3] : memref<8x32xf32, #tpu.memory_space<vmem>>, vector<8x32xf32>
    %10 = arith.mulf %9, %9 : vector<8x32xf32>
    %cst_4 = arith.constant dense<0.000000e+00> : vector<8xf32>
    %11 = vector.multi_reduction <add>, %10, %cst_4 [1] : vector<8x32xf32> to vector<8xf32>
    %12 = vector.shape_cast %11 : vector<8xf32> to vector<8x1xf32>
    %cst_5 = arith.constant 1.000000e-24 : f32
    %13 = vector.broadcast %cst_5 : f32 to vector<8x1xf32>
    %14 = arith.maximumf %12, %13 : vector<8x1xf32>
    %15 = math.rsqrt %14 : vector<8x1xf32>
    %c0_6 = arith.constant 0 : index
    %c0_7 = arith.constant 0 : index
    %16 = vector.load %arg2[%c0_6, %c0_7] : memref<8x32xf32, #tpu.memory_space<vmem>>, vector<8x32xf32>
    %cst_8 = arith.constant dense<0.000000e+00> : vector<8x128xf32>
    %17 = tpu.matmul %16, %8, %cst_8 {dimension_numbers = #tpu.dot_dimension_numbers<[1], [1], [0], [0], [0, 0, 1, 0], [], []>} : vector<8x32xf32>, vector<128x32xf32>, vector<8x128xf32> -> vector<8x128xf32>
    %18 = vector.broadcast %15 : vector<8x1xf32> to vector<8x128xf32>
    %19 = arith.mulf %17, %18 : vector<8x128xf32>
    %c0_9 = arith.constant 0 : index
    %c0_10 = arith.constant 0 : index
    %20 = vector.load %arg4[%c0_9, %c0_10] : memref<8x1xi32, #tpu.memory_space<vmem>>, vector<8x1xi32>
    %c128_i32 = arith.constant 128 : i32
    %21 = arith.muli %arg0, %c128_i32 : i32
    %22 = tpu.iota {dimensions = array<i32: 1>} : vector<8x128xi32>
    %23 = vector.broadcast %21 : i32 to vector<8x128xi32>
    %24 = arith.addi %23, %22 : vector<8x128xi32>
    %25 = vector.broadcast %20 : vector<8x1xi32> to vector<8x128xi32>
    %26 = arith.cmpi eq, %24, %25 : vector<8x128xi32>
    %cst_11 = arith.constant 0.000000e+00 : f32
    %27 = vector.broadcast %cst_11 : f32 to vector<8x128xf32>
    %28 = arith.select %26, %19, %27 : vector<8x128xi1>, vector<8x128xf32>
    %cst_12 = arith.constant dense<0.000000e+00> : vector<8xf32>
    %29 = vector.multi_reduction <add>, %28, %cst_12 [1] : vector<8x128xf32> to vector<8xf32>
    %30 = vector.shape_cast %29 : vector<8xf32> to vector<8x1xf32>
    %cst_13 = arith.constant -0.99999988 : f32
    %cst_14 = arith.constant 0.99999988 : f32
    %31 = vector.broadcast %cst_13 : f32 to vector<8x1xf32>
    %32 = arith.maximumf %31, %30 : vector<8x1xf32>
    %33 = vector.broadcast %cst_14 : f32 to vector<8x1xf32>
    %34 = arith.minimumf %33, %32 : vector<8x1xf32>
    %cst_15 = arith.constant 0.87758255 : f32
    %35 = vector.broadcast %cst_15 : f32 to vector<8x1xf32>
    %36 = arith.mulf %34, %35 : vector<8x1xf32>
    %37 = arith.mulf %34, %34 : vector<8x1xf32>
    %cst_16 = arith.constant 1.000000e+00 : f32
    %38 = vector.broadcast %cst_16 : f32 to vector<8x1xf32>
    %39 = arith.subf %38, %37 : vector<8x1xf32>
    %40 = math.sqrt %39 : vector<8x1xf32>
    %cst_17 = arith.constant 0.47942555 : f32
    %41 = vector.broadcast %cst_17 : f32 to vector<8x1xf32>
    %42 = arith.mulf %40, %41 : vector<8x1xf32>
    %43 = arith.subf %36, %42 : vector<8x1xf32>
    %cst_18 = arith.constant 3.000000e+01 : f32
    %44 = vector.broadcast %cst_18 : f32 to vector<8x1xf32>
    %45 = arith.mulf %44, %43 : vector<8x1xf32>
    %cst_19 = arith.constant 3.000000e+01 : f32
    %46 = vector.broadcast %cst_19 : f32 to vector<8x128xf32>
    %47 = arith.mulf %46, %19 : vector<8x128xf32>
    %48 = vector.shape_cast %45 : vector<8x1xf32> to vector<8x1xf32>
    %49 = vector.broadcast %48 : vector<8x1xf32> to vector<8x128xf32>
    %50 = arith.select %26, %49, %47 : vector<8x128xi1>, vector<8x128xf32>
    %c0_20 = arith.constant 0 : index
    %c0_21 = arith.constant 0 : index
    %51 = vector.load %arg5[%c0_20, %c0_21] : memref<8x128xf32, #tpu.memory_space<vmem>>, vector<8x128xf32>
    tpu.vector_store %arg5[%c0_20, %c0_21], %50 {strides = array<i32>} : memref<8x128xf32, #tpu.memory_space<vmem>>, vector<8x128xf32>,
    return
  }
  func.func @transform_0(%arg0: i32, %arg1: i32) -> (i32, i32) {
    %c0_i32 = arith.constant 0 : i32
    %c0_i32_0 = arith.constant 0 : i32
    return %arg1, %c0_i32 : i32, i32
  }
  func.func @transform_1(%arg0: i32, %arg1: i32) -> (i32, i32) {
    %c0_i32 = arith.constant 0 : i32
    %c0_i32_0 = arith.constant 0 : i32
    return %arg0, %c0_i32 : i32, i32
  }
  func.func @transform_2(%arg0: i32, %arg1: i32) -> (i32, i32) {
    %c0_i32 = arith.constant 0 : i32
    %c0_i32_0 = arith.constant 0 : i32
    return %arg1, %c0_i32 : i32, i32
  }
  func.func @transform_3(%arg0: i32, %arg1: i32) -> (i32, i32) {
    %c0_i32 = arith.constant 0 : i32
    return %arg1, %arg0 : i32, i32
  }
}

</mosaic_0001>

<bundles_post_ra>
// kernel: tpu_custom_call.1
= control target key start
LH: loop header
LB: loop body
LE: loop exit
PB: predicated region body
PF: predicated region fallthrough
CT: control target
= control target key end

     0   :  { %vm47_vm0 = vcmask 261120   ;;  %s943_s0 = inlined_call_operand.vmem [shape: f32[8,32], index: 0, kind: input, shape index: {}]   ;;  %s944_s1 = inlined_call_operand.vmem [shape: f32[128,32], index: 1, kind: input, shape index: {}]   ;;  %s945_s2 = inlined_call_operand.vmem [shape: s32[8,1], index: 2, kind: input, shape index: {}]   ;;  %s946_s3 = inlined_call_operand.hbm [shape: f32[8,128], index: 3, kind: output, shape index: {}]  }
   0x1   :  { %v537_v0 = vld [vmem:[%s944_s1 + $0x78] sm:$0xff]  ;;  %v542_v1 = vld [vmem:[%s944_s1 + $0x68] sm:$0xff]  ;;  %v558_v6 = vld [vmem:[%s944_s1 + $0x70] sm:$0xff] }
   0x2   :  { %v547_v2 = vld [vmem:[%s944_s1 + $0x58] sm:$0xff]  ;;  %v46_v3 = vmul.f32 %v537_v0, %v537_v0  ;;  %v44_v4 = vmul.f32 %v542_v1, %v542_v1  ;;  %v563_v7 = vld [vmem:[%s944_s1 + $0x60] sm:$0xff]  ;;  %v571_v11 = vld [vmem:[%s944_s1 + $0x50] sm:$0xff]  ;;  %v45_v12 = vmul.f32 %v558_v6, %v558_v6 }
   0x3   :  { %v42_v5 = vmul.f32 %v547_v2, %v547_v2  ;;  %v43_v13 = vmul.f32 %v563_v7, %v563_v7 }
   0x4   :  { %v93_v8 = vsel %vm47_vm0, %v46_v3, 0.0  ;;  %v87_v9 = vsel %vm47_vm0, %v44_v4, 0.0 }
   0x5   :  { %v81_v10 = vsel %vm47_vm0, %v42_v5, 0.0  ;;  %94 = vadd.xlane.f32.xlu0 %v93_v8  ;;  %88 = vadd.xlane.f32.xlu1 %v87_v9 }
   0x6   :  { %82 = vadd.xlane.f32.xlu2 %v81_v10 }
   0x7   :  { %8 = vsyncpa [#allocation3], 0  ;;  %v41_v14 = vmul.f32 %v571_v11, %v571_v11  ;;  %v90_v15 = vsel %vm47_vm0, %v45_v12, 0.0  ;;  %v84_v16 = vsel %vm47_vm0, %v43_v13, 0.0  ;;  %v585_v18 = vld [vmem:[%s944_s1 + $0x48] sm:$0xff]  ;;  %v590_v19 = vld [vmem:[%s944_s1 + $0x40] sm:$0xff] }
   0x8   :  { %v595_v20 = vld [vmem:[%s944_s1 + $0x38] sm:$0xff]  ;;  %v40_v21 = vmul.f32 %v585_v18, %v585_v18  ;;  %v39_v22 = vmul.f32 %v590_v19, %v590_v19  ;;  %v609_v27 = vld [vmem:[%s944_s1 + $0x30] sm:$0xff]  ;;  %v614_v28 = vld [vmem:[%s944_s1 + $0x28] sm:$0xff]  ;;  %s419_s22 = sshll.u32 %s946_s3, 4  ;;  %s420_s22 = int_to_ptr.hbm [resolvable:$true] %s419_s22 }
   0x9   :  { %v78_v17 = vsel %vm47_vm0, %v41_v14, 0.0  ;;  %v38_v23 = vmul.f32 %v595_v20, %v595_v20  ;;  %v619_v29 = vld [vmem:[%s944_s1 + $0x20] sm:$0xff]  ;;  %v37_v30 = vmul.f32 %v609_v27, %v609_v27  ;;  %v36_v31 = vmul.f32 %v614_v28, %v614_v28  ;;  %v633_v36 = vld [vmem:[%s944_s1 + $0x18] sm:$0xff]  ;;  %v638_v37 = vld [vmem:[%s944_s1 + $0x10] sm:$0xff] }
   0xa   :  { %v75_v24 = vsel %vm47_vm0, %v40_v21, 0.0  ;;  %v72_v25 = vsel %vm47_vm0, %v39_v22, 0.0  ;;  %v35_v32 = vmul.f32 %v619_v29, %v619_v29  ;;  %v643_v38 = vld [vmem:[%s944_s1 + $0x8] sm:$0xff]  ;;  %v34_v39 = vmul.f32 %v633_v36, %v633_v36  ;;  %v657_v45 = vld [vmem:[%s944_s1] sm:$0xff] }
   0xb   :  { %v69_v26 = vsel %vm47_vm0, %v38_v23, 0.0  ;;  %v66_v33 = vsel %vm47_vm0, %v37_v30, 0.0  ;;  %v63_v34 = vsel %vm47_vm0, %v36_v31, 0.0  ;;  %v33_v40 = vmul.f32 %v638_v37, %v638_v37 }
   0xc   :  { %v60_v35 = vsel %vm47_vm0, %v35_v32, 0.0  ;;  %v32_v41 = vmul.f32 %v643_v38, %v643_v38  ;;  %v57_v42 = vsel %vm47_vm0, %v34_v39, 0.0  ;;  %v31_v46 = vmul.f32 %v657_v45, %v657_v45 }
   0xd   :  { %91 = vadd.xlane.f32.xlu0 %v90_v15  ;;  %85 = vadd.xlane.f32.xlu1 %v84_v16  ;;  %v54_v43 = vsel %vm47_vm0, %v33_v40, 0.0 }
   0xe   :  { %79 = vadd.xlane.f32.xlu2 %v78_v17  ;;  %v51_v44 = vsel %vm47_vm0, %v32_v41, 0.0  ;;  %v48_v47 = vsel %vm47_vm0, %v31_v46, 0.0 }
  0x15   :  { %76 = vadd.xlane.f32.xlu0 %v75_v24  ;;  %73 = vadd.xlane.f32.xlu1 %v72_v25 }
  0x16   :  { %70 = vadd.xlane.f32.xlu2 %v69_v26 }
  0x1d   :  { %67 = vadd.xlane.f32.xlu0 %v66_v33  ;;  %64 = vadd.xlane.f32.xlu1 %v63_v34 }
  0x1e   :  { %61 = vadd.xlane.f32.xlu2 %v60_v35 }
  0x25   :  { %58 = vadd.xlane.f32.xlu0 %v57_v42  ;;  %55 = vadd.xlane.f32.xlu1 %v54_v43 }
  0x26   :  { %52 = vadd.xlane.f32.xlu2 %v51_v44 }
  0x2d   :  { %49 = vadd.xlane.f32.xlu0 %v48_v47 }
  0x78   :  { %v95_v48 = vpop.xlane.xlu0 %94  ;;  %v89_v49 = vpop.xlane.xlu1 %88 }
  0x79   :  { %v111_v50 = vmax.f32 %v95_v48, 1e-24  ;;  %v662_v51 = vmax.f32 %v89_v49, 1e-24  ;;  %v83_v52 = vpop.xlane.xlu2 %82 }
  0x7a   :  { %v665_v53 = vmax.f32 %v83_v52, 1e-24 }
  0x7b   :  { %450 = vrsqrt.f32 %v111_v50  ;;  %vm268_vm2 = vweird.f32 %v111_v50  ;;  %vm248_vm4 = vweird.f32 %v662_v51 }
  0x7c   :  { %452 = vrsqrt.f32 %v662_v51  ;;  %vm228_vm12 = vweird.f32 %v665_v53 }
  0x7d   :  { %454 = vrsqrt.f32 %v665_v53 }
  0x80   :  { %v92_v54 = vpop.xlane.xlu0 %91  ;;  %v86_v55 = vpop.xlane.xlu1 %85 }
  0x81   :  { %v451_v56 = vpop.eup %450  ;;  %v110_v57 = vmax.f32 %v92_v54, 1e-24  ;;  %v668_v58 = vmax.f32 %v86_v55, 1e-24  ;;  %v80_v59 = vpop.xlane.xlu2 %79 }
  0x82   :  { %v670_v60 = vpop.eup %452  ;;  %v263_v61 = vmul.f32 %v451_v56, %v111_v50  ;;  %v672_v62 = vmax.f32 %v80_v59, 1e-24  ;;  %vm269_vm1 = vweird.f32 %v451_v56 }
  0x83   :  { %v243_v63 = vmul.f32 %v670_v60, %v662_v51  ;;  %456 = vrsqrt.f32 %v110_v57  ;;  %v677_v4 = vpop.eup %454  ;;  %vm270_vm3 = vmor %vm268_vm2, %vm269_vm1  ;;  %vm249_vm6 = vweird.f32 %v670_v60  ;;  %vm258_vm7 = vweird.f32 %v110_v57 }
  0x84   :  { %v264_v3 = vmul.f32 %v451_v56, %v263_v61  ;;  %458 = vrsqrt.f32 %v668_v58  ;;  %v223_v13 = vmul.f32 %v677_v4, %v665_v53  ;;  %vm238_vm9 = vweird.f32 %v668_v58  ;;  %vm722_vm11 = vmor %vm248_vm4, %vm249_vm6 }
  0x85   :  { %460 = vrsqrt.f32 %v672_v62  ;;  %v244_v8 = vmul.f32 %v670_v60, %v243_v63  ;;  %vm229_vm13 = vweird.f32 %v677_v4  ;;  %vm218_vm1 = vweird.f32 %v672_v62 }
  0x86   :  { %v265_v5 = vmul.f32 0.5, %v264_v3  ;;  %v224_v30 = vmul.f32 %v677_v4, %v223_v13  ;;  %vm763_vm15 = vmor %vm228_vm12, %vm229_vm13 }
  0x87   :  { %v245_v23 = vmul.f32 0.5, %v244_v8 }
  0x88   :  { %v77_v9 = vpop.xlane.xlu0 %76  ;;  %v74_v10 = vpop.xlane.xlu1 %73  ;;  %v266_v17 = vsub.f32 1.5, %v265_v5  ;;  %v225_v46 = vmul.f32 0.5, %v224_v30 }
  0x89   :  { %v457_v12 = vpop.eup %456  ;;  %v683_v14 = vmax.f32 %v77_v9, 1e-24  ;;  %v685_v15 = vmax.f32 %v74_v10, 1e-24  ;;  %v71_v22 = vpop.xlane.xlu2 %70  ;;  %v246_v35 = vsub.f32 1.5, %v245_v23 }
  0x8a   :  { %v687_v16 = vpop.eup %458  ;;  %v253_v21 = vmul.f32 %v457_v12, %v110_v57  ;;  %v697_v32 = vmax.f32 %v71_v22, 1e-24  ;;  %v267_v34 = vmul.f32 %v451_v56, %v266_v17  ;;  %vm259_vm5 = vweird.f32 %v457_v12 }
  0x8b   :  { %v233_v24 = vmul.f32 %v687_v16, %v668_v58  ;;  %462 = vrsqrt.f32 %v683_v14  ;;  %v692_v25 = vpop.eup %460  ;;  %v247_v59 = vmul.f32 %v670_v60, %v246_v35  ;;  %vm260_vm8 = vmor %vm258_vm7, %vm259_vm5  ;;  %vm239_vm10 = vweird.f32 %v687_v16 }
  0x8c   :  { %v254_v26 = vmul.f32 %v457_v12, %v253_v21  ;;  %464 = vrsqrt.f32 %v685_v15  ;;  %v213_v40 = vmul.f32 %v692_v25, %v672_v62  ;;  %v271_v42 = vsel %vm270_vm3, %v451_v56, %v267_v34  ;;  %vm748_vm14 = vmor %vm238_vm9, %vm239_vm10 }
  0x8d   :  { %v234_v31 = vmul.f32 %v687_v16, %v233_v24  ;;  %466 = vrsqrt.f32 %v697_v32  ;;  %v287_v47 = vmul.f32 %v271_v42, %v537_v0  ;;  %v226_v0 = vsub.f32 1.5, %v225_v46 }
  0x8e   :  { %v255_v33 = vmul.f32 0.5, %v254_v26  ;;  %v214_v54 = vmul.f32 %v692_v25, %v213_v40  ;;  %v251_v51 = vsel %vm722_vm11, %v670_v60, %v247_v59  ;;  %vm219_vm2 = vweird.f32 %v692_v25 }
  0x8f   :  { %v235_v39 = vmul.f32 0.5, %v234_v31  ;;  %428 = vmatpush.xpose.msk.msra.mxu0 %vm47_vm0, %v287_v47  ;;  %v285_v22 = vmul.f32 %v251_v51, %v542_v1  ;;  %v227_v26 = vmul.f32 %v677_v4, %v226_v0  ;;  %vm788_vm3 = vmor %vm218_vm1, %vm219_vm2  ;;  %vm208_vm4 = vweird.f32 %v683_v14 }
  0x90   :  { %v256_v41 = vsub.f32 1.5, %v255_v33  ;;  %v68_v43 = vpop.xlane.xlu0 %67  ;;  %v65_v56 = vpop.xlane.xlu1 %64  ;;  %v215_v10 = vmul.f32 0.5, %v214_v54  ;;  %vm198_vm6 = vweird.f32 %v685_v15  ;;  %vm188_vm10 = vweird.f32 %v697_v32 }
  0x91   :  { %v702_v44 = vpop.eup %462  ;;  %v707_v48 = vmax.f32 %v68_v43, 1e-24  ;;  %v236_v52 = vsub.f32 1.5, %v235_v39  ;;  %v62_v61 = vpop.xlane.xlu2 %61  ;;  %v729_v5 = vmax.f32 %v65_v56, 1e-24  ;;  %v778_v39 = vld [vmem:[%s943_s0] sm:$0xff]  ;;  %v231_v62 = vsel %vm763_vm15, %v677_v4, %v227_v26 }
  0x92   :  { %v257_v49 = vmul.f32 %v457_v12, %v256_v41  ;;  %v709_v50 = vpop.eup %464  ;;  %v203_v55 = vmul.f32 %v702_v44, %v683_v14  ;;  %v740_v17 = vmax.f32 %v62_v61, 1e-24  ;;  %v216_v23 = vsub.f32 1.5, %v215_v10 }
  0x93   :  { %v193_v3 = vmul.f32 %v709_v50, %v685_v15  ;;  %468 = vrsqrt.f32 %v707_v48  ;;  %v732_v9 = vpop.eup %466  ;;  %v237_v13 = vmul.f32 %v687_v16, %v236_v52  ;;  %v289_v47 = vmul.f32 %v778_v39, %v778_v39 }
  0x94   :  { %v261_v57 = vsel %vm260_vm8, %v457_v12, %v257_v49  ;;  %v204_v12 = vmul.f32 %v702_v44, %v203_v55  ;;  %v183_v21 = vmul.f32 %v732_v9, %v697_v32  ;;  %470 = vrsqrt.f32 %v729_v5 }
  0x95   :  { %v286_v8 = vmul.f32 %v261_v57, %v558_v6  ;;  %v194_v60 = vmul.f32 %v709_v50, %v193_v3  ;;  %v241_v58 = vsel %vm748_vm14, %v687_v16, %v237_v13  ;;  %472 = vrsqrt.f32 %v740_v17 }
  0x96   :  { %v205_v24 = vmul.f32 0.5, %v204_v12  ;;  %v184_v16 = vmul.f32 %v732_v9, %v183_v21  ;;  %v284_v34 = vmul.f32 %v241_v58, %v563_v7  ;;  %v217_v42 = vmul.f32 %v692_v25, %v216_v23 }
  0x97   :  { %429 = vmatpush.xpose.msk.msra.mxu0 %vm47_vm0, %v286_v8  ;;  %v195_v33 = vmul.f32 0.5, %v194_v60  ;;  %vm209_vm5 = vweird.f32 %v702_v44  ;;  %v283_v54 = vmul.f32 %v231_v62, %v547_v2  ;;  %vm199_vm7 = vweird.f32 %v709_v50 }
  0x98   :  { %v59_v53 = vpop.xlane.xlu0 %58  ;;  %v56_v35 = vpop.xlane.xlu1 %55  ;;  %v206_v40 = vsub.f32 1.5, %v205_v24  ;;  %v185_v52 = vmul.f32 0.5, %v184_v16  ;;  %v221_v0 = vsel %vm788_vm3, %v692_v25, %v217_v42  ;;  %v290_v61 = vsel %vm47_vm0, %v289_v47, 0.0  ;;  %vm821_vm8 = vmor %vm208_vm4, %vm209_vm5 }
  0x99   :  { %v761_v30 = vpop.eup %468  ;;  %v771_v1 = vmax.f32 %v59_v53, 1e-24  ;;  %v795_v46 = vmax.f32 %v56_v35, 1e-24  ;;  %v196_v49 = vsub.f32 1.5, %v195_v33  ;;  %v53_v59 = vpop.xlane.xlu2 %52  ;;  %v282_v8 = vmul.f32 %v221_v0, %v571_v11  ;;  %291 = vadd.xlane.f32.xlu1 %v290_v61  ;;  %vm839_vm9 = vmor %vm198_vm6, %vm199_vm7 }
  0x9a   :  { %v173_v41 = vmul.f32 %v761_v30, %v707_v48  ;;  %v786_v43 = vpop.eup %470  ;;  %v207_v57 = vmul.f32 %v702_v44, %v206_v40  ;;  %v186_v63 = vsub.f32 1.5, %v185_v52  ;;  %v825_v3 = vmax.f32 %v53_v59, 1e-24 }
  0x9b   :  { %430 = vmatpush.xpose.msk.msra.mxu0 %vm47_vm0, %v285_v22  ;;  %474 = vrsqrt.f32 %v771_v1  ;;  %v799_v4 = vpop.eup %472  ;;  %v163_v56 = vmul.f32 %v786_v43, %v729_v5  ;;  %v197_v6 = vmul.f32 %v709_v50, %v196_v49  ;;  %vm189_vm11 = vweird.f32 %v732_v9 }
  0x9c   :  { %v174_v55 = vmul.f32 %v761_v30, %v173_v41  ;;  %v153_v2 = vmul.f32 %v799_v4, %v740_v17  ;;  %476 = vrsqrt.f32 %v795_v46  ;;  %v211_v14 = vsel %vm821_vm8, %v702_v44, %v207_v57  ;;  %vm859_vm12 = vmor %vm188_vm10, %vm189_vm11 }
  0x9d   :  { %v164_v51 = vmul.f32 %v786_v43, %v163_v56  ;;  %478 = vrsqrt.f32 %v825_v3  ;;  %v281_v15 = vmul.f32 %v211_v14, %v585_v18  ;;  %v201_v32 = vsel %vm839_vm9, %v709_v50, %v197_v6 }
  0x9e   :  { %v175_v12 = vmul.f32 0.5, %v174_v55  ;;  %v154_v11 = vmul.f32 %v799_v4, %v153_v2  ;;  %v187_v24 = vmul.f32 %v732_v9, %v186_v63  ;;  %vm178_vm13 = vweird.f32 %v707_v48 }
  0x9f   :  { %431 = vmatpush.xpose.msk.msra.mxu0 %vm47_vm0, %v284_v34  ;;  %v165_v23 = vmul.f32 0.5, %v164_v51  ;;  %vm179_vm14 = vweird.f32 %v761_v30  ;;  %v280_v50 = vmul.f32 %v201_v32, %v590_v19  ;;  %vm168_vm1 = vweird.f32 %v729_v5  ;;  %v376_v5 = vld [vmem:[%s945_s2] sm:$0xff]  ;;  %s513_s2 = smov [#allocation2]  }
  0xa0   :  { %v50_v13 = vpop.xlane.xlu0 %49  ;;  %v176_v53 = vsub.f32 1.5, %v175_v12  ;;  %v155_v18 = vmul.f32 0.5, %v154_v11  ;;  %v191_v16 = vsel %vm859_vm12, %v732_v9, %v187_v24  ;;  %vm877_vm15 = vmor %vm178_vm13, %vm179_vm14  ;;  %vm169_vm2 = vweird.f32 %v786_v43  ;;  %s417_s19 = sshll.u32 %s513_s2, 4  ;;  %s418_s19 = int_to_ptr.vmem [resolvable:$true] %s417_s19 }
  0xa1   :  { %v828_v10 = vpop.eup %474  ;;  %v850_v21 = vmax.f32 %v50_v13, 1e-24  ;;  %v166_v33 = vsub.f32 1.5, %v165_v23  ;;  %v279_v9 = vmul.f32 %v191_v16, %v595_v20  ;;  %vm895_vm3 = vmor %vm168_vm1, %vm169_vm2  ;;  %v512_v20 = vmov 0  }
  0xa2   :  { %v143_v44 = vmul.f32 %v828_v10, %v771_v1  ;;  %v853_v22 = vpop.eup %476  ;;  %v177_v34 = vmul.f32 %v761_v30, %v176_v53  ;;  %v156_v19 = vsub.f32 1.5, %v155_v18  ;;  %448 = vset.pattern.permute.xlu2 %v512_v20  ;;  %vm158_vm4 = vweird.f32 %v740_v17  ;;  %449 = vset.pattern.permute.xlu0 %v512_v20 }
  0xa3   :  { %432 = vmatpush.xpose.msk.msra.mxu0 %vm47_vm0, %v283_v54  ;;  %v133_v31 = vmul.f32 %v853_v22, %v795_v46  ;;  %480 = vrsqrt.f32 %v850_v21  ;;  %v875_v48 = vpop.eup %478  ;;  %v167_v7 = vmul.f32 %v786_v43, %v166_v33  ;;  %vm159_vm5 = vweird.f32 %v799_v4  ;;  %383 = vperm.xlu2 %448, %v376_v5  }
  0xa4   :  { %v144_v26 = vmul.f32 %v828_v10, %v143_v44  ;;  %v123_v62 = vmul.f32 %v875_v48, %v825_v3  ;;  %v181_v42 = vsel %vm877_vm15, %v761_v30, %v177_v34  ;;  %v157_v54 = vmul.f32 %v799_v4, %v156_v19  ;;  %vm160_vm6 = vmor %vm158_vm4, %vm159_vm5 }
  0xa5   :  { %v134_v41 = vmul.f32 %v853_v22, %v133_v31  ;;  %v278_v52 = vmul.f32 %v181_v42, %v609_v27  ;;  %v171_v0 = vsel %vm895_vm3, %v786_v43, %v167_v7  ;;  %vm148_vm7 = vweird.f32 %v771_v1 }
  0xa6   :  { %v145_v40 = vmul.f32 0.5, %v144_v26  ;;  %v124_v56 = vmul.f32 %v875_v48, %v123_v62  ;;  %vm149_vm8 = vweird.f32 %v828_v10  ;;  %v277_v27 = vmul.f32 %v171_v0, %v614_v28 }
  0xa7   :  { %433 = vmatpush.xpose.msk.msra.mxu0 %vm47_vm0, %v282_v8  ;;  %v135_v30 = vmul.f32 0.5, %v134_v41  ;;  %v161_v61 = vsel %vm160_vm6, %v799_v4, %v157_v54  ;;  %vm150_vm9 = vmor %vm148_vm7, %vm149_vm8  ;;  %vm138_vm10 = vweird.f32 %v795_v46  ;;  %vm139_vm11 = vweird.f32 %v853_v22 }
  0xa8   :  { %v146_v55 = vsub.f32 1.5, %v145_v40  ;;  %v125_v57 = vmul.f32 0.5, %v124_v56  ;;  %v276_v1 = vmul.f32 %v161_v61, %v619_v29  ;;  %vm140_vm12 = vmor %vm138_vm10, %vm139_vm11  ;;  %vm128_vm13 = vweird.f32 %v825_v3 }
  0xa9   :  { %v481_v47 = vpop.eup %480  ;;  %v136_v17 = vsub.f32 1.5, %v135_v30  ;;  %vm129_vm14 = vweird.f32 %v875_v48  ;;  %vm118_vm1 = vweird.f32 %v850_v21 }
  0xaa   :  { %v113_v59 = vmul.f32 %v481_v47, %v850_v21  ;;  %v147_v25 = vmul.f32 %v828_v10, %v146_v55  ;;  %v126_v43 = vsub.f32 1.5, %v125_v57  ;;  %vm130_vm15 = vmor %vm128_vm13, %vm129_vm14  ;;  %vm119_vm2 = vweird.f32 %v481_v47 }
  0xab   :  { %434 = vmatpush.xpose.msk.msra.mxu0 %vm47_vm0, %v281_v15  ;;  %v137_v28 = vmul.f32 %v853_v22, %v136_v17  ;;  %vm120_vm3 = vmor %vm118_vm1, %vm119_vm2 }
  0xac   :  { %v114_v2 = vmul.f32 %v481_v47, %v113_v59  ;;  %v151_v8 = vsel %vm150_vm9, %v828_v10, %v147_v25  ;;  %v127_v29 = vmul.f32 %v875_v48, %v126_v43 }
  0xad   :  { %v275_v4 = vmul.f32 %v151_v8, %v633_v36  ;;  %v141_v12 = vsel %vm140_vm12, %v853_v22, %v137_v28  ;;  %v378_v22 = vlaneseq }
  0xae   :  { %v115_v63 = vmul.f32 0.5, %v114_v2  ;;  %v274_v10 = vmul.f32 %v141_v12, %v638_v37  ;;  %v131_v51 = vsel %vm130_vm15, %v875_v48, %v127_v29 }
  0xaf   :  { %435 = vmatpush.xpose.msk.msra.mxu0 %vm47_vm0, %v280_v50  ;;  %v273_v36 = vmul.f32 %v131_v51, %v643_v38  ;;  %v379_v53 = vand.u32 127, %v378_v22 }
  0xb0   :  { %v116_v46 = vsub.f32 1.5, %v115_v63 }
  0xb2   :  { %v117_v3 = vmul.f32 %v481_v47, %v116_v46 }
  0xb3   :  { %436 = vmatpush.xpose.msk.msra.mxu0 %vm47_vm0, %v279_v9 }
  0xb4   :  { %v121_v13 = vsel %vm120_vm3, %v481_v47, %v117_v3 }
  0xb5   :  { %v272_v14 = vmul.f32 %v121_v13, %v657_v45 }
  0xb7   :  { %437 = vmatpush.xpose.msk.msra.mxu0 %vm47_vm0, %v278_v52 }
  0xbb   :  { %438 = vmatpush.xpose.msk.msra.mxu0 %vm47_vm0, %v277_v27 }
  0xbf   :  { %439 = vmatpush.xpose.msk.msra.mxu0 %vm47_vm0, %v276_v1 }
  0xc3   :  { %440 = vmatpush.xpose.msk.msra.mxu0 %vm47_vm0, %v275_v4 }
  0xc7   :  { %441 = vmatpush.xpose.msk.msra.mxu0 %vm47_vm0, %v274_v10 }
  0xcb   :  { %442 = vmatpush.xpose.msk.msra.mxu0 %vm47_vm0, %v273_v36 }
  0xcf   :  { %443 = vmatpush.xpose.msk.msra.mxu0 %vm47_vm0, %v272_v14 }
  0xd2   :  { %444 = vmatmul.msk.f32.vlgmr.msra.gmra.mxu0 %vm47_vm0, %v778_v39 }
  0xfd   :  { %v384_v45 = vpop.permute.xlu2 %383 }
  0xfe   :  { %vm385_vm7 = vcmp.eq.s32.totalorder %v379_v53, %v384_v45 }
 0x10c   :  { %v292_v6 = vpop.xlane.xlu1 %291 }
 0x10d   :  { %v293_v37 = vmax.f32 %v292_v6, 1e-24 }
 0x10f   :  { %482 = vrsqrt.f32 %v293_v37  ;;  %vm300_vm4 = vweird.f32 %v293_v37 }
 0x115   :  { %v483_v60 = vpop.eup %482 }
 0x116   :  { %v295_v11 = vmul.f32 %v483_v60, %v293_v37  ;;  %vm301_vm5 = vweird.f32 %v483_v60 }
 0x117   :  { %vm302_vm6 = vmor %vm300_vm4, %vm301_vm5 }
 0x118   :  { %v296_v44 = vmul.f32 %v483_v60, %v295_v11 }
 0x11a   :  { %v297_v21 = vmul.f32 0.5, %v296_v44 }
 0x11c   :  { %v298_v15 = vsub.f32 1.5, %v297_v21 }
 0x11e   :  { %v299_v38 = vmul.f32 %v483_v60, %v298_v15 }
 0x120   :  { %v303_v23 = vsel %vm302_vm6, %v483_v60, %v299_v38 }
 0x14f   :  { %v372_v32 = vpop.f32.mrf.mxu0 }
 0x150   :  { %v375_v24 = vmul.f32 %v372_v32, %v303_v23 }
 0x152   :  { %v386_v39 = vsel %vm385_vm7, %v375_v24, 0.0  ;;  %v409_v5 = vmul.f32 30.0, %v375_v24 }
 0x153   :  { %387 = vadd.xlane.f32.xlu0 %v386_v39 }
 0x1c6   :  { %v388_v58 = vpop.xlane.xlu0 %387 }
 0x1c7   :  { %v445_v18 = vclamps-f32 %v388_v58, 0.9999999 }
 0x1c9   :  { %v392_v26 = vmul.f32 %v445_v18, %v445_v18  ;;  %v391_v62 = vmul.f32 0.87758255, %v445_v18 }
 0x1cb   :  { %v393_v31 = vsub.f32 1.0, %v392_v26 }
 0x1cd   :  { %484 = vrsqrt.f32 %v393_v31  ;;  %vm401_vm0 = vcmp.eq.f32.partialorder %v393_v31, inf  ;;  %v404_v40 = vand.u32 2147483648, %v393_v31  ;;  %vm403_vm8 = vcmp.eq.f32.partialorder %v393_v31, 0.0 }
 0x1d3   :  { %v485_v50 = vpop.eup %484 }
 0x1d4   :  { %v395_v33 = vmul.f32 %v485_v50, %v393_v31 }
 0x1d6   :  { %v396_v16 = vmul.f32 %v485_v50, %v395_v33 }
 0x1d8   :  { %v397_v34 = vmul.f32 0.5, %v396_v16 }
 0x1da   :  { %v398_v48 = vsub.f32 1.5, %v397_v34 }
 0x1dc   :  { %v399_v35 = vmul.f32 %v485_v50, %v398_v48 }
 0x1de   :  { %v400_v19 = vmul.f32 %v399_v35, %v393_v31 }
 0x1e0   :  { %v402_v41 = vsel %vm401_vm0, %v393_v31, %v400_v19 }
 0x1e1   :  { %v405_v9 = vsel %vm403_vm8, %v404_v40, %v402_v41 }
 0x1e2   :  { %v406_v42 = vmul.f32 0.47942555, %v405_v9 }
 0x1e4   :  { %v407_v7 = vsub.f32 %v391_v62, %v406_v42 }
 0x1e6   :  { %v408_v47 = vmul.f32 30.0, %v407_v7 }
 0x1e8   :  { %v410_v49 = vsel %vm385_vm7, %v408_v47, %v409_v5 }
 0x1e9   :  { %411 = vst [vmem:[#allocation2] sm:$0xff] %v410_v49 }
 0x1ea   :  { %422 = dma.vmem_to_hbm [thread:$0]  %s418_s19, 128, %s420_s22, [#allocation3]  }
 0x1eb   :  { %510 = dma.done.wait [#allocation3], 128  }
 0x1ec   :  { %511 = vsyncadd [#allocation3], 4294967168 }
 0x1ed   :  { %427 = vsyncpa [#allocation3], 1 }

</bundles_post_ra>
